<compile_context>
chip_gen: v7x
topology: tpu7x:2x2x1
jax: 0.10.0
libtpu: 0.0.40
codegen_flags: <defaults>
</compile_context>

<pallas_src>
import functools
import math

import jax
import jax.numpy as jnp
from jax.experimental import pallas as pl
from jax.experimental.pallas import tpu as pltpu

_VMEM_LIMIT = 32 * 1024 * 1024
_BN_EPS = 1e-5


def _round_up(x, m):
    return ((x + m - 1) // m) * m


# --------------------------------------------------------------------------------------
# Pallas kernels
# --------------------------------------------------------------------------------------

def _matmul_stats_kernel(a_ref, b_ref, o_ref, sum_ref, ssq_ref,
                         acc_ref, s_acc_ref, ss_acc_ref):
    """C = A @ B (bf16 MXU, f32 acc) with fused per-column sum / sum-of-squares.

    Grid = (N-blocks j [parallel], M-blocks i [arbitrary], K-blocks k [arbitrary]).
    The (1, tn) stat accumulators live in scratch across the whole (i, k) sweep of a
    column block, so BatchNorm batch statistics never require re-reading the conv output.
    """
    i = pl.program_id(1)
    k = pl.program_id(2)
    last_i = pl.num_programs(1) - 1
    last_k = pl.num_programs(2) - 1

    @pl.when(k == 0)
    def _():
        acc_ref[...] = jnp.zeros_like(acc_ref)

    @pl.when(jnp.logical_and(i == 0, k == 0))
    def _():
        s_acc_ref[...] = jnp.zeros_like(s_acc_ref)
        ss_acc_ref[...] = jnp.zeros_like(ss_acc_ref)

    acc_ref[...] += jnp.dot(a_ref[...], b_ref[...], preferred_element_type=jnp.float32)

    @pl.when(k == last_k)
    def _():
        res = acc_ref[...]
        o_ref[...] = res.astype(o_ref.dtype)
        s_acc_ref[...] += jnp.sum(res, axis=0, keepdims=True)
        ss_acc_ref[...] += jnp.sum(res * res, axis=0, keepdims=True)

    @pl.when(jnp.logical_and(i == last_i, k == last_k))
    def _():
        sum_ref[...] = s_acc_ref[...]
        ssq_ref[...] = ss_acc_ref[...]


def _affine_kernel(x_ref, s_ref, b_ref, o_ref, *, relu):
    y = x_ref[...] * s_ref[...] + b_ref[...]
    if relu:
        y = jnp.maximum(y, 0.0)
    o_ref[...] = y


def _affine_res_kernel(x_ref, r_ref, s_ref, b_ref, o_ref, *, relu):
    y = x_ref[...] * s_ref[...] + b_ref[...] + r_ref[...]
    if relu:
        y = jnp.maximum(y, 0.0)
    o_ref[...] = y


def _add_kernel(a_ref, b_ref, o_ref):
    o_ref[...] = a_ref[...] + b_ref[...]


def _max9_kernel(*refs):
    o_ref = refs[-1]
    m = refs[0][...]
    for r in refs[1:-1]:
        m = jnp.maximum(m, r[...])
    o_ref[...] = m


# --------------------------------------------------------------------------------------
# Tiling helpers
# --------------------------------------------------------------------------------------

def _row_tile(M, C):
    """Row-block size for (M, C) f32 elementwise kernels (~2 MB per block)."""
    budget = max(8, (2 << 20) // (C * 4))
    tr = max(8, (min(1024, budget) // 8) * 8)
    Mp8 = _round_up(M, 8)
    return Mp8 if tr >= Mp8 else tr


def _lane_tile(dim, pref):
    """(tile, padded_dim) for a lane (last) matmul dim: multiples of 128, tile | padded."""
    p = _round_up(dim, 128)
    t = max(128, (min(pref, p) // 128) * 128)
    while p % t:
        t -= 128
    return t, p


def _sub_tile(dim, pref):
    """(tile, padded_dim) for the sublane dim of a bf16 matmul operand: multiples of 16."""
    p = _round_up(dim, 16)
    t = max(16, (min(pref, p) // 16) * 16)
    while p % t:
        t -= 16
    return t, p


# --------------------------------------------------------------------------------------
# Tiled MXU matmul with fused per-column BN statistics
# --------------------------------------------------------------------------------------

def _matmul_with_colstats(a, b):
    """(M, K) @ (K, N) -> (out f32 (M, N), mean (1, N), biased var (1, N))."""
    M, K = a.shape
    _, N = b.shape
    a = a.astype(jnp.bfloat16)
    b = b.astype(jnp.bfloat16)
    tm, Mp = _sub_tile(M, 512)
    tk, Kp = _lane_tile(K, 512)
    tn, Np = _lane_tile(N, 256)
    if (Mp, Kp) != (M, K):
        a = jnp.pad(a, ((0, Mp - M), (0, Kp - K)))   # zero rows/cols -> no stat bias
    if (Kp, Np) != (K, N):
        b = jnp.pad(b, ((0, Kp - K), (0, Np - N)))
    out_spec = pl.BlockSpec((tm, tn), lambda j, i, k: (i, j))
    stat_spec = pl.BlockSpec((1, tn), lambda j, i, k: (0, j))
    out, colsum, colsq = pl.pallas_call(
        _matmul_stats_kernel,
        out_shape=[jax.ShapeDtypeStruct((Mp, Np), jnp.float32),
                   jax.ShapeDtypeStruct((1, Np), jnp.float32),
                   jax.ShapeDtypeStruct((1, Np), jnp.float32)],
        grid_spec=pltpu.PrefetchScalarGridSpec(
            num_scalar_prefetch=0,
            grid=(Np // tn, Mp // tm, Kp // tk),
            in_specs=[pl.BlockSpec((tm, tk), lambda j, i, k: (i, k)),
                      pl.BlockSpec((tk, tn), lambda j, i, k: (k, j))],
            out_specs=[out_spec, stat_spec, stat_spec],
            scratch_shapes=[pltpu.VMEM((tm, tn), jnp.float32),
                            pltpu.VMEM((1, tn), jnp.float32),
                            pltpu.VMEM((1, tn), jnp.float32)]),
        compiler_params=pltpu.CompilerParams(
            dimension_semantics=("parallel", "arbitrary", "arbitrary"),
            vmem_limit_bytes=_VMEM_LIMIT),
    )(a, b)
    if (Mp, Np) != (M, N):
        out = out[:M, :N]
    if Np != N:
        colsum = colsum[:, :N]
        colsq = colsq[:, :N]
    inv_m = 1.0 / M                       # padded rows are zero -> only divide by true M
    mean = colsum * inv_m
    var = jnp.maximum(colsq * inv_m - mean * mean, 0.0)
    return out, mean, var


# --------------------------------------------------------------------------------------
# Tiled row-wise elementwise kernels on (M, C) activations
# --------------------------------------------------------------------------------------

def _tiled_rowwise(kernel, row_arrays, chan_arrays, M, C):
    """Run `kernel` over (M, C) arrays tiled along rows; chan_arrays are (1, C) residents."""
    TR = _row_tile(M, C)
    Mp = _round_up(M, TR)
    pad = Mp - M
    if pad:
        row_arrays = [jnp.pad(x, ((0, pad), (0, 0))) for x in row_arrays]
    row_spec = pl.BlockSpec((TR, C), lambda i: (i, 0))
    chan_spec = pl.BlockSpec((1, C), lambda i: (0, 0))
    out = pl.pallas_call(
        kernel,
        out_shape=jax.ShapeDtypeStruct((Mp, C), jnp.float32),
        grid_spec=pltpu.PrefetchScalarGridSpec(
            num_scalar_prefetch=0,
            grid=(Mp // TR,),
            in_specs=[row_spec] * len(row_arrays) + [chan_spec] * len(chan_arrays),
            out_specs=row_spec),
        compiler_params=pltpu.CompilerParams(
            dimension_semantics=("parallel",), vmem_limit_bytes=_VMEM_LIMIT),
    )(*row_arrays, *chan_arrays)
    return out[:M] if pad else out


@functools.partial(jax.jit, static_argnames=("relu",))
def _affine_rows(xm, scale, shift, residual=None, *, relu=False):
    """y = x * scale + shift (+ residual) (+ ReLU) on (M, C)."""
    M, C = xm.shape
    s2 = jnp.asarray(scale, jnp.float32).reshape(1, C)
    b2 = jnp.asarray(shift, jnp.float32).reshape(1, C)
    if residual is None:
        return _tiled_rowwise(functools.partial(_affine_kernel, relu=relu),
                              [xm], [s2, b2], M, C)
    return _tiled_rowwise(functools.partial(_affine_res_kernel, relu=relu),
                          [xm, residual], [s2, b2], M, C)


@jax.jit
def add_nhwc(a, b):
    shape = a.shape
    C = shape[-1]
    am = a.reshape(-1, C)
    bm = b.reshape(-1, C)
    return _tiled_rowwise(_add_kernel, [am, bm], [], am.shape[0], C).reshape(shape)


@jax.jit
def max_pool_3x3_s2_p1(x):
    """nn.MaxPool2d(kernel_size=3, stride=2, padding=1) on NHWC."""
    N, H, W, C = x.shape
    Ho, Wo = (H - 1) // 2 + 1, (W - 1) // 2 + 1
    xp = jnp.pad(x, ((0, 0), (1, 1), (1, 1), (0, 0)), constant_values=-jnp.inf)
    # TODO(synk): the 9 shifted windows are materialized by XLA slicing; an in-kernel
    # halo/window DMA would avoid this residual traffic (pool runs once, at the stem).
    slices = [
        xp[:, dy:dy + 2 * Ho:2, dx:dx + 2 * Wo:2, :][:, :Ho, :Wo, :].reshape(-1, C)
        for dy in range(3) for dx in range(3)
    ]
    M = N * Ho * Wo
    out = _tiled_rowwise(_max9_kernel, slices, [], M, C)
    return out.reshape(N, Ho, Wo, C)


# --------------------------------------------------------------------------------------
# Fused Conv2d (im2col, bf16 MXU) + training-mode BatchNorm (+ residual) (+ ReLU), NHWC
# --------------------------------------------------------------------------------------

@functools.partial(jax.jit, static_argnames=("stride", "padding", "relu"))
def _conv_bn_impl(x, w, gamma, beta, residual, *, stride, padding, relu):
    N, H, W, C = x.shape
    Cout, Cin, kh, kw = w.shape
    xb = x.astype(jnp.bfloat16)
    if padding:
        xb = jnp.pad(xb, ((0, 0), (padding, padding), (padding, padding), (0, 0)))
    Hp, Wp = H + 2 * padding, W + 2 * padding
    Ho = (Hp - kh) // stride + 1
    Wo = (Wp - kw) // stride + 1
    if kh == 1 and kw == 1:
        if stride == 1:
            cols = xb.reshape(-1, C)
        else:
            cols = xb[:, ::stride, ::stride, :][:, :Ho, :Wo, :].reshape(-1, C)
        wmat = w.reshape(Cout, Cin).T                                  # (Cin, Cout)
    else:
        # TODO(synk): im2col patch extraction is still JAX-side glue (kh*kw shifted bf16
        # copies); an in-kernel halo-DMA conv would remove this last HBM amplifier.
        slabs = [
            xb[:, dy:dy + stride * Ho:stride, dx:dx + stride * Wo:stride, :][:, :Ho, :Wo, :]
            for dy in range(kh) for dx in range(kw)
        ]
        pat = jnp.stack(slabs, axis=3)                                 # (N,Ho,Wo,kh*kw,Cin)
        cols = pat.reshape(N * Ho * Wo, kh * kw * Cin)
        wmat = w.transpose(2, 3, 1, 0).reshape(kh * kw * Cin, Cout)    # (dy,dx,c) order
    y, mean, var = _matmul_with_colstats(cols, wmat)
    scale = gamma.reshape(1, Cout) * jax.lax.rsqrt(var + _BN_EPS)
    shift = beta.reshape(1, Cout) - mean * scale
    rm = residual.reshape(-1, Cout) if residual is not None else None
    out = _affine_rows(y, scale, shift, rm, relu=relu)
    return out.reshape(N, Ho, Wo, Cout)


def conv_bn(x, conv_w, bn, *, stride=1, padding=0, residual=None, relu=False):
    """Bias-free Conv2d + BatchNorm2d (batch statistics) + optional residual add / ReLU."""
    return _conv_bn_impl(x, conv_w, bn["gamma"], bn["beta"], residual,
                         stride=stride, padding=padding, relu=relu)


# --------------------------------------------------------------------------------------
# Parameters (deterministic synthetic init, shapes of resnet50 + FPN v2)
# --------------------------------------------------------------------------------------

class ParamFactory:
    def __init__(self, seed=0):
        self._key = jax.random.PRNGKey(seed)

    def _next(self):
        self._key, k = jax.random.split(self._key)
        return k

    def conv(self, cout, cin, kh, kw):
        std = math.sqrt(2.0 / (cin * kh * kw))
        return jax.random.normal(self._next(), (cout, cin, kh, kw), jnp.float32) * std

    def bn(self, c):
        return {"gamma": jnp.ones((c,), jnp.float32), "beta": jnp.zeros((c,), jnp.float32)}


def make_bottleneck_params(pf, inplanes, planes, stride, downsample):
    p = {
        "conv1": pf.conv(planes, inplanes, 1, 1), "bn1": pf.bn(planes),
        "conv2": pf.conv(planes, planes, 3, 3), "bn2": pf.bn(planes),
        "conv3": pf.conv(planes * 4, planes, 1, 1), "bn3": pf.bn(planes * 4),
        "stride": stride,
    }
    if downsample:
        p["down_conv"] = pf.conv(planes * 4, inplanes, 1, 1)
        p["down_bn"] = pf.bn(planes * 4)
    return p


def make_layer_params(pf, inplanes, planes, blocks, stride):
    params = [make_bottleneck_params(pf, inplanes, planes, stride,
                                     downsample=(stride != 1 or inplanes != planes * 4))]
    inplanes = planes * 4
    for _ in range(1, blocks):
        params.append(make_bottleneck_params(pf, inplanes, planes, 1, False))
    return params, inplanes


def make_fpn_params(pf, in_channels_list, out_channels=256):
    inner = [{"conv": pf.conv(out_channels, c, 1, 1), "bn": pf.bn(out_channels)}
             for c in in_channels_list]
    layer = [{"conv": pf.conv(out_channels, out_channels, 3, 3), "bn": pf.bn(out_channels)}
             for _ in in_channels_list]
    return {"inner": inner, "layer": layer}


def build_params(seed=0, min_size=64, max_size=64):
    pf = ParamFactory(seed)
    params = {"stem": {"conv": pf.conv(64, 3, 7, 7), "bn": pf.bn(64)}}
    inplanes = 64
    for name, planes, blocks, stride in (("layer1", 64, 3, 1), ("layer2", 128, 4, 2),
                                         ("layer3", 256, 6, 2), ("layer4", 512, 3, 2)):
        params[name], inplanes = make_layer_params(pf, inplanes, planes, blocks, stride)
    params["fpn"] = make_fpn_params(pf, [256, 512, 1024, 2048], 256)
    params["image_mean"] = jnp.array([0.485, 0.456, 0.406], jnp.float32)
    params["image_std"] = jnp.array([0.229, 0.224, 0.225], jnp.float32)
    # torchvision defaults: min_size=800, max_size=1333 (scaled down for the demo).
    params["min_size"] = min_size
    params["max_size"] = max_size
    return params


# --------------------------------------------------------------------------------------
# Forward pass (NHWC internally; NCHW only at the module boundary)
# --------------------------------------------------------------------------------------

def rcnn_transform(x_nchw, params):
    """GeneralizedRCNNTransform: normalize -> resize -> pad to multiple of 32."""
    N, C, H, W = x_nchw.shape
    x = jnp.transpose(x_nchw, (0, 2, 3, 1))               # NHWC from here on
    scale_c = 1.0 / params["image_std"]
    shift_c = -params["image_mean"] / params["image_std"]
    x = _affine_rows(x.reshape(-1, C), scale_c, shift_c, None, relu=False).reshape(N, H, W, C)
    scale = min(params["min_size"] / min(H, W), params["max_size"] / max(H, W))
    if scale != 1.0:
        nh, nw = int(round(H * scale)), int(round(W * scale))
        # TODO(synk): bilinear resize kept as plain-JAX glue (jax.image.resize), not Pallas.
        x = jax.image.resize(x, (N, nh, nw, C), method="bilinear")
        H, W = nh, nw
    Hp, Wp = _round_up(H, 32), _round_up(W, 32)
    if (Hp, Wp) != (H, W):
        x = jnp.pad(x, ((0, 0), (0, Hp - H), (0, Wp - W), (0, 0)))
    return x


def bottleneck_forward(p, x):
    identity = x
    out = conv_bn(x, p["conv1"], p["bn1"], relu=True)
    out = conv_bn(out, p["conv2"], p["bn2"], stride=p["stride"], padding=1, relu=True)
    if "down_conv" in p:
        identity = conv_bn(x, p["down_conv"], p["down_bn"], stride=p["stride"])
    # conv3 + bn3 + residual add + ReLU: stats fused in matmul, affine fused with residual
    return conv_bn(out, p["conv3"], p["bn3"], residual=identity, relu=True)


def nearest_upsample_to(x, out_hw):
    N, H, W, C = x.shape
    Ho, Wo = out_hw
    ih = (jnp.arange(Ho) * H) // Ho
    iw = (jnp.arange(Wo) * W) // Wo
    # TODO(synk): nearest-neighbour gather kept as plain-JAX indexing glue.
    return x[:, ih[:, None], iw[None, :], :]


def fpn_forward(p, feats):
    last_inner = conv_bn(feats[-1], p["inner"][-1]["conv"], p["inner"][-1]["bn"])
    results = [conv_bn(last_inner, p["layer"][-1]["conv"], p["layer"][-1]["bn"], padding=1)]
    for idx in range(len(feats) - 2, -1, -1):
        inner_lateral = conv_bn(feats[idx], p["inner"][idx]["conv"], p["inner"][idx]["bn"])
        top_down = nearest_upsample_to(last_inner, inner_lateral.shape[1:3])
        last_inner = add_nhwc(inner_lateral, top_down)
        results.insert(0, conv_bn(last_inner, p["layer"][idx]["conv"], p["layer"][idx]["bn"],
                                  padding=1))
    # LastLevelMaxPool: F.max_pool2d(x, kernel_size=1, stride=2, padding=0) == stride-2 subsample
    results.append(results[-1][:, ::2, ::2, :])
    return dict(zip(["0", "1", "2", "3", "pool"], results))


def rcnn_backbone_forward(params, x):
    x = rcnn_transform(x, params)                          # transform(x).tensors  (NHWC)
    x = conv_bn(x, params["stem"]["conv"], params["stem"]["bn"], stride=2, padding=3, relu=True)
    x = max_pool_3x3_s2_p1(x)
    feats = []
    for name in ("layer1", "layer2", "layer3", "layer4"):
        for blk in params[name]:
            x = bottleneck_forward(blk, x)
        feats.append(x)
    outs = fpn_forward(params["fpn"], feats)
    # module boundary: return NCHW tensors like torchvision's backbone
    return {k: jnp.transpose(v, (0, 3, 1, 2)) for k, v in outs.items()}


# --------------------------------------------------------------------------------------

if __name__ == "__main__":
    key = jax.random.PRNGKey(0)
    x = jax.random.uniform(key, (2, 3, 64, 64), dtype=jnp.float32)

    params = build_params(seed=0, min_size=64, max_size=64)
    out = rcnn_backbone_forward(params, x)
    out = jax.tree_util.tree_map(jax.block_until_ready, out)

    expected = {"0": (2, 256, 16, 16), "1": (2, 256, 8, 8), "2": (2, 256, 4, 4),
                "3": (2, 256, 2, 2), "pool": (2, 256, 1, 1)}
    for k, shape in expected.items():
        assert out[k].shape == shape, (k, out[k].shape, shape)
        assert bool(jnp.all(jnp.isfinite(out[k])))
    print("KERNEL_OK")
</pallas_src>

<mosaic_0001>
module attributes {stable_mosaic.version = 11 : i64} {
  func.func @_affine_kernel(%arg0: i32, %arg1: memref<1024x3xf32, #tpu.memory_space<vmem>>, %arg2: memref<1x3xf32, #tpu.memory_space<vmem>>, %arg3: memref<1x3xf32, #tpu.memory_space<vmem>>, %arg4: memref<1024x3xf32, #tpu.memory_space<vmem>>) attributes {dimension_semantics = [#tpu.dimension_semantics<parallel>], iteration_bounds = array<i64: 8>, scalar_prefetch = 0 : i64, scratch_operands = 0 : i64, tpu.core_type = #tpu.core_type<tc>, window_params = [{transform_indices = @transform_0, window_bounds = array<i64: 1024, 3>}, {pipeline_mode = #tpu.pipeline_mode<synchronous>, transform_indices = @transform_1, window_bounds = array<i64: 1, 3>}, {pipeline_mode = #tpu.pipeline_mode<synchronous>, transform_indices = @transform_2, window_bounds = array<i64: 1, 3>}, {transform_indices = @transform_3, window_bounds = array<i64: 1024, 3>}]} {
    %c0 = arith.constant 0 : index
    %c0_0 = arith.constant 0 : index
    %0 = vector.load %arg1[%c0, %c0_0] : memref<1024x3xf32, #tpu.memory_space<vmem>>, vector<1024x3xf32>
    %c0_1 = arith.constant 0 : index
    %c0_2 = arith.constant 0 : index
    %1 = vector.load %arg2[%c0_1, %c0_2] : memref<1x3xf32, #tpu.memory_space<vmem>>, vector<1x3xf32>
    %2 = vector.broadcast %1 : vector<1x3xf32> to vector<1024x3xf32>
    %3 = arith.mulf %0, %2 : vector<1024x3xf32>
    %c0_3 = arith.constant 0 : index
    %c0_4 = arith.constant 0 : index
    %4 = vector.load %arg3[%c0_3, %c0_4] : memref<1x3xf32, #tpu.memory_space<vmem>>, vector<1x3xf32>
    %5 = vector.broadcast %4 : vector<1x3xf32> to vector<1024x3xf32>
    %6 = arith.addf %3, %5 : vector<1024x3xf32>
    %c0_5 = arith.constant 0 : index
    %c0_6 = arith.constant 0 : index
    %7 = vector.load %arg4[%c0_5, %c0_6] : memref<1024x3xf32, #tpu.memory_space<vmem>>, vector<1024x3xf32>
    tpu.vector_store %arg4[%c0_5, %c0_6], %6 {strides = array<i32>} : memref<1024x3xf32, #tpu.memory_space<vmem>>, vector<1024x3xf32>,
    return
  }
  func.func @transform_0(%arg0: i32) -> (i32, i32) {
    %c0_i32 = arith.constant 0 : i32
    %c0_i32_0 = arith.constant 0 : i32
    return %arg0, %c0_i32 : i32, i32
  }
  func.func @transform_1(%arg0: i32) -> (i32, i32) {
    %c0_i32 = arith.constant 0 : i32
    %c0_i32_0 = arith.constant 0 : i32
    %c0_i32_1 = arith.constant 0 : i32
    return %c0_i32, %c0_i32_0 : i32, i32
  }
  func.func @transform_2(%arg0: i32) -> (i32, i32) {
    %c0_i32 = arith.constant 0 : i32
    %c0_i32_0 = arith.constant 0 : i32
    %c0_i32_1 = arith.constant 0 : i32
    return %c0_i32, %c0_i32_0 : i32, i32
  }
  func.func @transform_3(%arg0: i32) -> (i32, i32) {
    %c0_i32 = arith.constant 0 : i32
    %c0_i32_0 = arith.constant 0 : i32
    return %arg0, %c0_i32 : i32, i32
  }
}

</mosaic_0001>

<bundles_post_ra>
// kernel: _affine_rows.1
= control target key start
LH: loop header
LB: loop body
LE: loop exit
PB: predicated region body
PF: predicated region fallthrough
CT: control target
= control target key end

     0   :  { %s807_s12 = smov 0   ;;  %s1480_s0 = inlined_call_operand.vmem [shape: f32[8192,3], index: 0, kind: input, shape index: {}]   ;;  %s1481_s1 = inlined_call_operand.vmem [shape: f32[1,3], index: 1, kind: input, shape index: {}]   ;;  %s1482_s2 = inlined_call_operand.vmem [shape: f32[1,3], index: 2, kind: input, shape index: {}]   ;;  %s1483_s3 = inlined_call_operand.vmem [shape: f32[8192,3], index: 3, kind: output, shape index: {}]  }
   0x1 LB: > { %s757_s13 = sadd.s32 4294967295, %s785_s12   ;;  %p761_p0 = scmp.ge.s32.totalorder %s785_s12, 1  ;;  %s785_s12 = sphi %s807_s12, %s13_s12  }
   0x2   : > { %p138_p1 = scmp.lt.s32.totalorder %s785_s12, 9 }
   0x4   : > { %p139_p2 = pnand %p761_p0, %p138_p1 }
   0x5   : > { %s762_s14 = sshll.u32 (!%p139_p2), %s757_s13, 7  ;;  %v818_v0 = vld [vmem:[%s1481_s1] ss:$0 sm:$0xff] (!%p139_p2)  ;;  %vm572_vm0 = vcmask (!%p139_p2), 23552  }
   0x6   : > { %142 = sbr.rel (%p139_p2) target bundleno = 97 (0x61), region = 32  ;;  %p163_p3 = scmp.lt.s32.totalorder (!%p139_p2), %s762_s14, 1023  ;;  %v828_v1 = vld [vmem:[%s1482_s2] ss:$0 sm:$0xff] (!%p139_p2) }
   0xd   : > { %s1485_s14 = smov (!%p163_p3, %s762_s14), 1023 }
   0xe   : > { %s763_s15 = sshll.u32 %s1485_s14, 3 }
   0xf   : > { %s823_s20 = scalar_lea.vmem %s1480_s0, %s763_s15  ;;  %s842_s25 = scalar_lea.vmem %s1483_s3, %s763_s15 }
  0x10   : > { %v174_v2 = vld [vmem:[%s823_s20] sm:$0xff]  ;;  %v175_v3 = vld [vmem:[%s823_s20 + $0x8] sm:$0xff]  ;;  %v176_v4 = vld [vmem:[%s823_s20 + $0x10] sm:$0xff] }
  0x11   : > { %v309_v5 = vmul.f32 %v818_v0, %v174_v2  ;;  %v310_v6 = vmul.f32 %v818_v0, %v175_v3  ;;  %v311_v7 = vmul.f32 %v818_v0, %v176_v4  ;;  %v177_v8 = vld [vmem:[%s823_s20 + $0x18] sm:$0xff]  ;;  %v178_v9 = vld [vmem:[%s823_s20 + $0x20] sm:$0xff]  ;;  %v179_v10 = vld [vmem:[%s823_s20 + $0x28] sm:$0xff] }
  0x12   : > { %v312_v11 = vmul.f32 %v818_v0, %v177_v8  ;;  %v313_v12 = vmul.f32 %v818_v0, %v178_v9  ;;  %v314_v13 = vmul.f32 %v818_v0, %v179_v10  ;;  %v180_v14 = vld [vmem:[%s823_s20 + $0x30] sm:$0xff]  ;;  %v181_v15 = vld [vmem:[%s823_s20 + $0x38] sm:$0xff]  ;;  %v182_v16 = vld [vmem:[%s823_s20 + $0x40] sm:$0xff] }
  0x13   : > { %v444_v17 = vadd.f32 %v828_v1, %v309_v5  ;;  %v445_v18 = vadd.f32 %v828_v1, %v310_v6  ;;  %v446_v19 = vadd.f32 %v828_v1, %v311_v7  ;;  %v315_v20 = vmul.f32 %v818_v0, %v180_v14  ;;  %v183_v21 = vld [vmem:[%s823_s20 + $0x48] sm:$0xff]  ;;  %v184_v22 = vld [vmem:[%s823_s20 + $0x50] sm:$0xff]  ;;  %v185_v23 = vld [vmem:[%s823_s20 + $0x58] sm:$0xff] }
  0x14   : > { %v447_v24 = vadd.f32 %v828_v1, %v312_v11  ;;  %v448_v25 = vadd.f32 %v828_v1, %v313_v12  ;;  %v449_v26 = vadd.f32 %v828_v1, %v314_v13  ;;  %v316_v27 = vmul.f32 %v818_v0, %v181_v15  ;;  %v186_v28 = vld [vmem:[%s823_s20 + $0x60] sm:$0xff]  ;;  %v187_v29 = vld [vmem:[%s823_s20 + $0x68] sm:$0xff]  ;;  %v188_v30 = vld [vmem:[%s823_s20 + $0x70] sm:$0xff] }
  0x15   : > { %573 = vst.msk [vmem:[%s842_s25] sm:$0xff] %vm572_vm0, %v444_v17  ;;  %574 = vst.msk [vmem:[%s842_s25 + $0x8] sm:$0xff] %vm572_vm0, %v445_v18  ;;  %v450_v31 = vadd.f32 %v828_v1, %v315_v20  ;;  %v317_v32 = vmul.f32 %v818_v0, %v182_v16  ;;  %v318_v33 = vmul.f32 %v818_v0, %v183_v21  ;;  %v189_v35 = vld [vmem:[%s823_s20 + $0x78] sm:$0xff]  ;;  %v190_v40 = vld [vmem:[%s823_s20 + $0x80] sm:$0xff] }
  0x16   : > { %575 = vst.msk [vmem:[%s842_s25 + $0x10] sm:$0xff] %vm572_vm0, %v446_v19  ;;  %v319_v34 = vmul.f32 %v818_v0, %v184_v22  ;;  %576 = vst.msk [vmem:[%s842_s25 + $0x18] sm:$0xff] %vm572_vm0, %v447_v24  ;;  %v451_v36 = vadd.f32 %v828_v1, %v316_v27  ;;  %v320_v37 = vmul.f32 %v818_v0, %v185_v23  ;;  %v191_v41 = vld [vmem:[%s823_s20 + $0x88] sm:$0xff]  ;;  %v192_v42 = vld [vmem:[%s823_s20 + $0x90] sm:$0xff] }
  0x17   : > { %577 = vst.msk [vmem:[%s842_s25 + $0x20] sm:$0xff] %vm572_vm0, %v448_v25  ;;  %578 = vst.msk [vmem:[%s842_s25 + $0x28] sm:$0xff] %vm572_vm0, %v449_v26  ;;  %v321_v38 = vmul.f32 %v818_v0, %v186_v28  ;;  %v322_v39 = vmul.f32 %v818_v0, %v187_v29  ;;  %v452_v43 = vadd.f32 %v828_v1, %v317_v32  ;;  %v193_v47 = vld [vmem:[%s823_s20 + $0x98] sm:$0xff]  ;;  %v194_v48 = vld [vmem:[%s823_s20 + $0xa0] sm:$0xff] }
  0x18   : > { %579 = vst.msk [vmem:[%s842_s25 + $0x30] sm:$0xff] %vm572_vm0, %v450_v31  ;;  %v453_v44 = vadd.f32 %v828_v1, %v318_v33  ;;  %v454_v45 = vadd.f32 %v828_v1, %v319_v34  ;;  %v323_v46 = vmul.f32 %v818_v0, %v188_v30  ;;  %v195_v49 = vld [vmem:[%s823_s20 + $0xa8] sm:$0xff]  ;;  %580 = vst.msk [vmem:[%s842_s25 + $0x38] sm:$0xff] %vm572_vm0, %v451_v36  ;;  %v196_v54 = vld [vmem:[%s823_s20 + $0xb0] sm:$0xff] }
  0x19   : > { %v455_v50 = vadd.f32 %v828_v1, %v320_v37  ;;  %v456_v51 = vadd.f32 %v828_v1, %v321_v38  ;;  %v457_v52 = vadd.f32 %v828_v1, %v322_v39  ;;  %v324_v53 = vmul.f32 %v818_v0, %v189_v35  ;;  %581 = vst.msk [vmem:[%s842_s25 + $0x40] sm:$0xff] %vm572_vm0, %v452_v43  ;;  %v197_v59 = vld [vmem:[%s823_s20 + $0xb8] sm:$0xff]  ;;  %v198_v2 = vld [vmem:[%s823_s20 + $0xc0] sm:$0xff]  ;;  %v199_v3 = vld [vmem:[%s823_s20 + $0xc8] sm:$0xff] }
  0x1a   : > { %582 = vst.msk [vmem:[%s842_s25 + $0x48] sm:$0xff] %vm572_vm0, %v453_v44  ;;  %583 = vst.msk [vmem:[%s842_s25 + $0x50] sm:$0xff] %vm572_vm0, %v454_v45  ;;  %v458_v55 = vadd.f32 %v828_v1, %v323_v46  ;;  %v325_v56 = vmul.f32 %v818_v0, %v190_v40  ;;  %v326_v57 = vmul.f32 %v818_v0, %v191_v41  ;;  %v200_v4 = vld [vmem:[%s823_s20 + $0xd0] sm:$0xff]  ;;  %v201_v9 = vld [vmem:[%s823_s20 + $0xd8] sm:$0xff] }
  0x1b   : > { %v327_v58 = vmul.f32 %v818_v0, %v192_v42  ;;  %584 = vst.msk [vmem:[%s842_s25 + $0x58] sm:$0xff] %vm572_vm0, %v455_v50  ;;  %585 = vst.msk [vmem:[%s842_s25 + $0x60] sm:$0xff] %vm572_vm0, %v456_v51  ;;  %v459_v60 = vadd.f32 %v828_v1, %v324_v53  ;;  %v328_v61 = vmul.f32 %v818_v0, %v193_v47  ;;  %v202_v10 = vld [vmem:[%s823_s20 + $0xe0] sm:$0xff]  ;;  %v203_v11 = vld [vmem:[%s823_s20 + $0xe8] sm:$0xff] }
  0x1c   : > { %586 = vst.msk [vmem:[%s842_s25 + $0x68] sm:$0xff] %vm572_vm0, %v457_v52  ;;  %v329_v62 = vmul.f32 %v818_v0, %v194_v48  ;;  %v330_v63 = vmul.f32 %v818_v0, %v195_v49  ;;  %587 = vst.msk [vmem:[%s842_s25 + $0x70] sm:$0xff] %vm572_vm0, %v458_v55  ;;  %v460_v5 = vadd.f32 %v828_v1, %v325_v56  ;;  %v204_v16 = vld [vmem:[%s823_s20 + $0xf0] sm:$0xff]  ;;  %v205_v21 = vld [vmem:[%s823_s20 + $0xf8] sm:$0xff] }
  0x1d   : > { %v461_v6 = vadd.f32 %v828_v1, %v326_v57  ;;  %v462_v7 = vadd.f32 %v828_v1, %v327_v58  ;;  %v331_v8 = vmul.f32 %v818_v0, %v196_v54  ;;  %588 = vst.msk [vmem:[%s842_s25 + $0x78] sm:$0xff] %vm572_vm0, %v459_v60  ;;  %v463_v12 = vadd.f32 %v828_v1, %v328_v61  ;;  %v206_v26 = vld [vmem:[%s823_s20 + $0x100] sm:$0xff]  ;;  %v207_v27 = vld [vmem:[%s823_s20 + $0x108] sm:$0xff]  ;;  %v208_v28 = vld [vmem:[%s823_s20 + $0x110] sm:$0xff] }
  0x1e   : > { %v464_v13 = vadd.f32 %v828_v1, %v329_v62  ;;  %v465_v14 = vadd.f32 %v828_v1, %v330_v63  ;;  %v332_v15 = vmul.f32 %v818_v0, %v197_v59  ;;  %589 = vst.msk [vmem:[%s842_s25 + $0x80] sm:$0xff] %vm572_vm0, %v460_v5  ;;  %v333_v18 = vmul.f32 %v818_v0, %v198_v2  ;;  %v209_v33 = vld [vmem:[%s823_s20 + $0x118] sm:$0xff]  ;;  %v210_v34 = vld [vmem:[%s823_s20 + $0x120] sm:$0xff]  ;;  %v211_v35 = vld [vmem:[%s823_s20 + $0x128] sm:$0xff] }
  0x1f   : > { %590 = vst.msk [vmem:[%s842_s25 + $0x88] sm:$0xff] %vm572_vm0, %v461_v6  ;;  %591 = vst.msk [vmem:[%s842_s25 + $0x90] sm:$0xff] %vm572_vm0, %v462_v7  ;;  %v466_v17 = vadd.f32 %v828_v1, %v331_v8  ;;  %v334_v19 = vmul.f32 %v818_v0, %v199_v3  ;;  %v335_v20 = vmul.f32 %v818_v0, %v200_v4  ;;  %v212_v40 = vld [vmem:[%s823_s20 + $0x130] sm:$0xff]  ;;  %v213_v45 = vld [vmem:[%s823_s20 + $0x138] sm:$0xff] }
  0x20   : > { %592 = vst.msk [vmem:[%s842_s25 + $0x98] sm:$0xff] %vm572_vm0, %v463_v12  ;;  %593 = vst.msk [vmem:[%s842_s25 + $0xa0] sm:$0xff] %vm572_vm0, %v464_v13  ;;  %v467_v22 = vadd.f32 %v828_v1, %v332_v15  ;;  %v336_v23 = vmul.f32 %v818_v0, %v201_v9  ;;  %v337_v24 = vmul.f32 %v818_v0, %v202_v10  ;;  %v214_v50 = vld [vmem:[%s823_s20 + $0x140] sm:$0xff]  ;;  %v215_v51 = vld [vmem:[%s823_s20 + $0x148] sm:$0xff] }
  0x21   : > { %594 = vst.msk [vmem:[%s842_s25 + $0xa8] sm:$0xff] %vm572_vm0, %v465_v14  ;;  %v338_v25 = vmul.f32 %v818_v0, %v203_v11  ;;  %595 = vst.msk [vmem:[%s842_s25 + $0xb0] sm:$0xff] %vm572_vm0, %v466_v17  ;;  %v468_v29 = vadd.f32 %v828_v1, %v333_v18  ;;  %v469_v30 = vadd.f32 %v828_v1, %v334_v19  ;;  %v216_v52 = vld [vmem:[%s823_s20 + $0x150] sm:$0xff]  ;;  %v217_v57 = vld [vmem:[%s823_s20 + $0x158] sm:$0xff] }
  0x22   : > { %v470_v31 = vadd.f32 %v828_v1, %v335_v20  ;;  %v339_v32 = vmul.f32 %v818_v0, %v204_v16  ;;  %596 = vst.msk [vmem:[%s842_s25 + $0xb8] sm:$0xff] %vm572_vm0, %v467_v22  ;;  %v471_v36 = vadd.f32 %v828_v1, %v336_v23  ;;  %v472_v37 = vadd.f32 %v828_v1, %v337_v24  ;;  %v218_v58 = vld [vmem:[%s823_s20 + $0x160] sm:$0xff]  ;;  %v219_v59 = vld [vmem:[%s823_s20 + $0x168] sm:$0xff]  ;;  %v220_v2 = vld [vmem:[%s823_s20 + $0x170] sm:$0xff] }
  0x23   : > { %v473_v38 = vadd.f32 %v828_v1, %v338_v25  ;;  %v340_v39 = vmul.f32 %v818_v0, %v205_v21  ;;  %597 = vst.msk [vmem:[%s842_s25 + $0xc0] sm:$0xff] %vm572_vm0, %v468_v29  ;;  %598 = vst.msk [vmem:[%s842_s25 + $0xc8] sm:$0xff] %vm572_vm0, %v469_v30  ;;  %v341_v42 = vmul.f32 %v818_v0, %v206_v26  ;;  %v221_v7 = vld [vmem:[%s823_s20 + $0x178] sm:$0xff]  ;;  %v222_v12 = vld [vmem:[%s823_s20 + $0x180] sm:$0xff] }
  0x24   : > { %599 = vst.msk [vmem:[%s842_s25 + $0xd0] sm:$0xff] %vm572_vm0, %v470_v31  ;;  %v474_v41 = vadd.f32 %v828_v1, %v339_v32  ;;  %v342_v43 = vmul.f32 %v818_v0, %v207_v27  ;;  %v343_v44 = vmul.f32 %v818_v0, %v208_v28  ;;  %600 = vst.msk [vmem:[%s842_s25 + $0xd8] sm:$0xff] %vm572_vm0, %v471_v36  ;;  %v223_v13 = vld [vmem:[%s823_s20 + $0x188] sm:$0xff]  ;;  %v224_v14 = vld [vmem:[%s823_s20 + $0x190] sm:$0xff] }
  0x25   : > { %601 = vst.msk [vmem:[%s842_s25 + $0xe0] sm:$0xff] %vm572_vm0, %v472_v37  ;;  %602 = vst.msk [vmem:[%s842_s25 + $0xe8] sm:$0xff] %vm572_vm0, %v473_v38  ;;  %v475_v46 = vadd.f32 %v828_v1, %v340_v39  ;;  %v344_v47 = vmul.f32 %v818_v0, %v209_v33  ;;  %v345_v48 = vmul.f32 %v818_v0, %v210_v34  ;;  %v225_v19 = vld [vmem:[%s823_s20 + $0x198] sm:$0xff]  ;;  %v226_v20 = vld [vmem:[%s823_s20 + $0x1a0] sm:$0xff] }
  0x26   : > { %v346_v49 = vmul.f32 %v818_v0, %v211_v35  ;;  %603 = vst.msk [vmem:[%s842_s25 + $0xf0] sm:$0xff] %vm572_vm0, %v474_v41  ;;  %v476_v53 = vadd.f32 %v828_v1, %v341_v42  ;;  %v477_v54 = vadd.f32 %v828_v1, %v342_v43  ;;  %v478_v55 = vadd.f32 %v828_v1, %v343_v44  ;;  %v227_v21 = vld [vmem:[%s823_s20 + $0x1a8] sm:$0xff]  ;;  %v228_v26 = vld [vmem:[%s823_s20 + $0x1b0] sm:$0xff]  ;;  %v229_v31 = vld [vmem:[%s823_s20 + $0x1b8] sm:$0xff] }
  0x27   : > { %v347_v56 = vmul.f32 %v818_v0, %v212_v40  ;;  %604 = vst.msk [vmem:[%s842_s25 + $0xf8] sm:$0xff] %vm572_vm0, %v475_v46  ;;  %v479_v60 = vadd.f32 %v828_v1, %v344_v47  ;;  %v480_v61 = vadd.f32 %v828_v1, %v345_v48  ;;  %v348_v63 = vmul.f32 %v818_v0, %v213_v45  ;;  %v230_v36 = vld [vmem:[%s823_s20 + $0x1c0] sm:$0xff]  ;;  %v231_v37 = vld [vmem:[%s823_s20 + $0x1c8] sm:$0xff]  ;;  %v232_v38 = vld [vmem:[%s823_s20 + $0x1d0] sm:$0xff] }
  0x28   : > { %v481_v62 = vadd.f32 %v828_v1, %v346_v49  ;;  %605 = vst.msk [vmem:[%s842_s25 + $0x100] sm:$0xff] %vm572_vm0, %v476_v53  ;;  %606 = vst.msk [vmem:[%s842_s25 + $0x108] sm:$0xff] %vm572_vm0, %v477_v54  ;;  %v349_v4 = vmul.f32 %v818_v0, %v214_v50  ;;  %v350_v5 = vmul.f32 %v818_v0, %v215_v51  ;;  %v233_v43 = vld [vmem:[%s823_s20 + $0x1d8] sm:$0xff]  ;;  %v234_v44 = vld [vmem:[%s823_s20 + $0x1e0] sm:$0xff] }
  0x29   : > { %607 = vst.msk [vmem:[%s842_s25 + $0x110] sm:$0xff] %vm572_vm0, %v478_v55  ;;  %v482_v3 = vadd.f32 %v828_v1, %v347_v56  ;;  %v351_v6 = vmul.f32 %v818_v0, %v216_v52  ;;  %608 = vst.msk [vmem:[%s842_s25 + $0x118] sm:$0xff] %vm572_vm0, %v479_v60  ;;  %v483_v8 = vadd.f32 %v828_v1, %v348_v63  ;;  %v235_v45 = vld [vmem:[%s823_s20 + $0x1e8] sm:$0xff]  ;;  %v236_v50 = vld [vmem:[%s823_s20 + $0x1f0] sm:$0xff] }
  0x2a   : > { %609 = vst.msk [vmem:[%s842_s25 + $0x120] sm:$0xff] %vm572_vm0, %v480_v61  ;;  %610 = vst.msk [vmem:[%s842_s25 + $0x128] sm:$0xff] %vm572_vm0, %v481_v62  ;;  %v352_v9 = vmul.f32 %v818_v0, %v217_v57  ;;  %v353_v10 = vmul.f32 %v818_v0, %v218_v58  ;;  %v354_v11 = vmul.f32 %v818_v0, %v219_v59  ;;  %v237_v55 = vld [vmem:[%s823_s20 + $0x1f8] sm:$0xff]  ;;  %v238_v60 = vld [vmem:[%s823_s20 + $0x200] sm:$0xff] }
  0x2b   : > { %611 = vst.msk [vmem:[%s842_s25 + $0x130] sm:$0xff] %vm572_vm0, %v482_v3  ;;  %v484_v15 = vadd.f32 %v828_v1, %v349_v4  ;;  %v485_v16 = vadd.f32 %v828_v1, %v350_v5  ;;  %v486_v17 = vadd.f32 %v828_v1, %v351_v6  ;;  %v355_v18 = vmul.f32 %v818_v0, %v220_v2  ;;  %v239_v61 = vld [vmem:[%s823_s20 + $0x208] sm:$0xff]  ;;  %v240_v62 = vld [vmem:[%s823_s20 + $0x210] sm:$0xff]  ;;  %v241_v5 = vld [vmem:[%s823_s20 + $0x218] sm:$0xff] }
  0x2c   : > { %612 = vst.msk [vmem:[%s842_s25 + $0x138] sm:$0xff] %vm572_vm0, %v483_v8  ;;  %v487_v22 = vadd.f32 %v828_v1, %v352_v9  ;;  %v488_v23 = vadd.f32 %v828_v1, %v353_v10  ;;  %v489_v24 = vadd.f32 %v828_v1, %v354_v11  ;;  %v356_v25 = vmul.f32 %v818_v0, %v221_v7  ;;  %v242_v6 = vld [vmem:[%s823_s20 + $0x220] sm:$0xff]  ;;  %v243_v7 = vld [vmem:[%s823_s20 + $0x228] sm:$0xff] }
  0x2d   : > { %613 = vst.msk [vmem:[%s842_s25 + $0x140] sm:$0xff] %vm572_vm0, %v484_v15  ;;  %614 = vst.msk [vmem:[%s842_s25 + $0x148] sm:$0xff] %vm572_vm0, %v485_v16  ;;  %v490_v27 = vadd.f32 %v828_v1, %v355_v18  ;;  %v357_v28 = vmul.f32 %v818_v0, %v222_v12  ;;  %v358_v29 = vmul.f32 %v818_v0, %v223_v13  ;;  %v244_v12 = vld [vmem:[%s823_s20 + $0x230] sm:$0xff] }
  0x2e   : > { %615 = vst.msk [vmem:[%s842_s25 + $0x150] sm:$0xff] %vm572_vm0, %v486_v17  ;;  %v359_v30 = vmul.f32 %v818_v0, %v224_v14  ;;  %616 = vst.msk [vmem:[%s842_s25 + $0x158] sm:$0xff] %vm572_vm0, %v487_v22  ;;  %v491_v32 = vadd.f32 %v828_v1, %v356_v25  ;;  %v360_v33 = vmul.f32 %v818_v0, %v225_v19  ;;  %v245_v17 = vld [vmem:[%s823_s20 + $0x238] sm:$0xff]  ;;  %v246_v22 = vld [vmem:[%s823_s20 + $0x240] sm:$0xff] }
  0x2f   : > { %617 = vst.msk [vmem:[%s842_s25 + $0x160] sm:$0xff] %vm572_vm0, %v488_v23  ;;  %618 = vst.msk [vmem:[%s842_s25 + $0x168] sm:$0xff] %vm572_vm0, %v489_v24  ;;  %v361_v34 = vmul.f32 %v818_v0, %v226_v20  ;;  %v362_v35 = vmul.f32 %v818_v0, %v227_v21  ;;  %v492_v39 = vadd.f32 %v828_v1, %v357_v28  ;;  %v247_v23 = vld [vmem:[%s823_s20 + $0x248] sm:$0xff]  ;;  %v248_v24 = vld [vmem:[%s823_s20 + $0x250] sm:$0xff] }
  0x30   : > { %619 = vst.msk [vmem:[%s842_s25 + $0x170] sm:$0xff] %vm572_vm0, %v490_v27  ;;  %v493_v40 = vadd.f32 %v828_v1, %v358_v29  ;;  %v494_v41 = vadd.f32 %v828_v1, %v359_v30  ;;  %v363_v42 = vmul.f32 %v818_v0, %v228_v26  ;;  %620 = vst.msk [vmem:[%s842_s25 + $0x178] sm:$0xff] %vm572_vm0, %v491_v32  ;;  %v249_v29 = vld [vmem:[%s823_s20 + $0x258] sm:$0xff]  ;;  %v250_v30 = vld [vmem:[%s823_s20 + $0x260] sm:$0xff] }
  0x31   : > { %v495_v46 = vadd.f32 %v828_v1, %v360_v33  ;;  %v496_v47 = vadd.f32 %v828_v1, %v361_v34  ;;  %v497_v48 = vadd.f32 %v828_v1, %v362_v35  ;;  %v364_v49 = vmul.f32 %v818_v0, %v229_v31  ;;  %621 = vst.msk [vmem:[%s842_s25 + $0x180] sm:$0xff] %vm572_vm0, %v492_v39  ;;  %v251_v31 = vld [vmem:[%s823_s20 + $0x268] sm:$0xff] }
  0x32   : > { %622 = vst.msk [vmem:[%s842_s25 + $0x188] sm:$0xff] %vm572_vm0, %v493_v40  ;;  %623 = vst.msk [vmem:[%s842_s25 + $0x190] sm:$0xff] %vm572_vm0, %v494_v41  ;;  %v498_v51 = vadd.f32 %v828_v1, %v363_v42  ;;  %v365_v52 = vmul.f32 %v818_v0, %v230_v36  ;;  %v366_v53 = vmul.f32 %v818_v0, %v231_v37  ;;  %v252_v36 = vld [vmem:[%s823_s20 + $0x270] sm:$0xff]  ;;  %v253_v41 = vld [vmem:[%s823_s20 + $0x278] sm:$0xff] }
  0x33   : > { %v367_v54 = vmul.f32 %v818_v0, %v232_v38  ;;  %624 = vst.msk [vmem:[%s842_s25 + $0x198] sm:$0xff] %vm572_vm0, %v495_v46  ;;  %625 = vst.msk [vmem:[%s842_s25 + $0x1a0] sm:$0xff] %vm572_vm0, %v496_v47  ;;  %v499_v56 = vadd.f32 %v828_v1, %v364_v49  ;;  %v368_v57 = vmul.f32 %v818_v0, %v233_v43  ;;  %v254_v46 = vld [vmem:[%s823_s20 + $0x280] sm:$0xff]  ;;  %v255_v47 = vld [vmem:[%s823_s20 + $0x288] sm:$0xff] }
  0x34   : > { %626 = vst.msk [vmem:[%s842_s25 + $0x1a8] sm:$0xff] %vm572_vm0, %v497_v48  ;;  %v369_v58 = vmul.f32 %v818_v0, %v234_v44  ;;  %v370_v59 = vmul.f32 %v818_v0, %v235_v45  ;;  %627 = vst.msk [vmem:[%s842_s25 + $0x1b0] sm:$0xff] %vm572_vm0, %v498_v51  ;;  %v500_v63 = vadd.f32 %v828_v1, %v365_v52  ;;  %v256_v48 = vld [vmem:[%s823_s20 + $0x290] sm:$0xff] }
  0x35   : > { %v501_v2 = vadd.f32 %v828_v1, %v366_v53  ;;  %v502_v3 = vadd.f32 %v828_v1, %v367_v54  ;;  %v371_v4 = vmul.f32 %v818_v0, %v236_v50  ;;  %628 = vst.msk [vmem:[%s842_s25 + $0x1b8] sm:$0xff] %vm572_vm0, %v499_v56  ;;  %v503_v8 = vadd.f32 %v828_v1, %v368_v57  ;;  %v257_v53 = vld [vmem:[%s823_s20 + $0x298] sm:$0xff]  ;;  %v258_v54 = vld [vmem:[%s823_s20 + $0x2a0] sm:$0xff] }
  0x36   : > { %v504_v9 = vadd.f32 %v828_v1, %v369_v58  ;;  %v505_v10 = vadd.f32 %v828_v1, %v370_v59  ;;  %v372_v11 = vmul.f32 %v818_v0, %v237_v55  ;;  %629 = vst.msk [vmem:[%s842_s25 + $0x1c0] sm:$0xff] %vm572_vm0, %v500_v63  ;;  %v373_v14 = vmul.f32 %v818_v0, %v238_v60  ;;  %v259_v55 = vld [vmem:[%s823_s20 + $0x2a8] sm:$0xff]  ;;  %v260_v60 = vld [vmem:[%s823_s20 + $0x2b0] sm:$0xff] }
  0x37   : > { %630 = vst.msk [vmem:[%s842_s25 + $0x1c8] sm:$0xff] %vm572_vm0, %v501_v2  ;;  %631 = vst.msk [vmem:[%s842_s25 + $0x1d0] sm:$0xff] %vm572_vm0, %v502_v3  ;;  %v506_v13 = vadd.f32 %v828_v1, %v371_v4  ;;  %v374_v15 = vmul.f32 %v818_v0, %v239_v61  ;;  %v375_v16 = vmul.f32 %v818_v0, %v240_v62  ;;  %v261_v3 = vld [vmem:[%s823_s20 + $0x2b8] sm:$0xff] }
  0x38   : > { %632 = vst.msk [vmem:[%s842_s25 + $0x1d8] sm:$0xff] %vm572_vm0, %v503_v8  ;;  %633 = vst.msk [vmem:[%s842_s25 + $0x1e0] sm:$0xff] %vm572_vm0, %v504_v9  ;;  %v507_v18 = vadd.f32 %v828_v1, %v372_v11  ;;  %v376_v19 = vmul.f32 %v818_v0, %v241_v5  ;;  %v377_v20 = vmul.f32 %v818_v0, %v242_v6  ;;  %v262_v8 = vld [vmem:[%s823_s20 + $0x2c0] sm:$0xff]  ;;  %v263_v9 = vld [vmem:[%s823_s20 + $0x2c8] sm:$0xff] }
  0x39   : > { %634 = vst.msk [vmem:[%s842_s25 + $0x1e8] sm:$0xff] %vm572_vm0, %v505_v10  ;;  %v378_v21 = vmul.f32 %v818_v0, %v243_v7  ;;  %635 = vst.msk [vmem:[%s842_s25 + $0x1f0] sm:$0xff] %vm572_vm0, %v506_v13  ;;  %v508_v25 = vadd.f32 %v828_v1, %v373_v14  ;;  %v509_v26 = vadd.f32 %v828_v1, %v374_v15  ;;  %v264_v10 = vld [vmem:[%s823_s20 + $0x2d0] sm:$0xff]  ;;  %v265_v15 = vld [vmem:[%s823_s20 + $0x2d8] sm:$0xff] }
  0x3a   : > { %v510_v27 = vadd.f32 %v828_v1, %v375_v16  ;;  %v379_v28 = vmul.f32 %v818_v0, %v244_v12  ;;  %636 = vst.msk [vmem:[%s842_s25 + $0x1f8] sm:$0xff] %vm572_vm0, %v507_v18  ;;  %v511_v32 = vadd.f32 %v828_v1, %v376_v19  ;;  %v512_v33 = vadd.f32 %v828_v1, %v377_v20  ;;  %v266_v16 = vld [vmem:[%s823_s20 + $0x2e0] sm:$0xff] }
  0x3b   : > { %v513_v34 = vadd.f32 %v828_v1, %v378_v21  ;;  %v380_v35 = vmul.f32 %v818_v0, %v245_v17  ;;  %637 = vst.msk [vmem:[%s842_s25 + $0x200] sm:$0xff] %vm572_vm0, %v508_v25  ;;  %638 = vst.msk [vmem:[%s842_s25 + $0x208] sm:$0xff] %vm572_vm0, %v509_v26  ;;  %v381_v38 = vmul.f32 %v818_v0, %v246_v22  ;;  %v267_v17 = vld [vmem:[%s823_s20 + $0x2e8] sm:$0xff]  ;;  %v268_v22 = vld [vmem:[%s823_s20 + $0x2f0] sm:$0xff] }
  0x3c   : > { %639 = vst.msk [vmem:[%s842_s25 + $0x210] sm:$0xff] %vm572_vm0, %v510_v27  ;;  %v514_v37 = vadd.f32 %v828_v1, %v379_v28  ;;  %v382_v39 = vmul.f32 %v818_v0, %v247_v23  ;;  %v383_v40 = vmul.f32 %v818_v0, %v248_v24  ;;  %640 = vst.msk [vmem:[%s842_s25 + $0x218] sm:$0xff] %vm572_vm0, %v511_v32  ;;  %v269_v27 = vld [vmem:[%s823_s20 + $0x2f8] sm:$0xff]  ;;  %v270_v32 = vld [vmem:[%s823_s20 + $0x300] sm:$0xff] }
  0x3d   : > { %641 = vst.msk [vmem:[%s842_s25 + $0x220] sm:$0xff] %vm572_vm0, %v512_v33  ;;  %642 = vst.msk [vmem:[%s842_s25 + $0x228] sm:$0xff] %vm572_vm0, %v513_v34  ;;  %v515_v42 = vadd.f32 %v828_v1, %v380_v35  ;;  %v384_v43 = vmul.f32 %v818_v0, %v249_v29  ;;  %v385_v44 = vmul.f32 %v818_v0, %v250_v30  ;;  %v271_v33 = vld [vmem:[%s823_s20 + $0x308] sm:$0xff]  ;;  %v272_v34 = vld [vmem:[%s823_s20 + $0x310] sm:$0xff] }
  0x3e   : > { %v386_v45 = vmul.f32 %v818_v0, %v251_v31  ;;  %643 = vst.msk [vmem:[%s842_s25 + $0x230] sm:$0xff] %vm572_vm0, %v514_v37  ;;  %v516_v49 = vadd.f32 %v828_v1, %v381_v38  ;;  %v517_v50 = vadd.f32 %v828_v1, %v382_v39  ;;  %v518_v51 = vadd.f32 %v828_v1, %v383_v40  ;;  %v273_v39 = vld [vmem:[%s823_s20 + $0x318] sm:$0xff]  ;;  %v274_v40 = vld [vmem:[%s823_s20 + $0x320] sm:$0xff] }
  0x3f   : > { %v387_v52 = vmul.f32 %v818_v0, %v252_v36  ;;  %644 = vst.msk [vmem:[%s842_s25 + $0x238] sm:$0xff] %vm572_vm0, %v515_v42  ;;  %v519_v56 = vadd.f32 %v828_v1, %v384_v43  ;;  %v520_v57 = vadd.f32 %v828_v1, %v385_v44  ;;  %v388_v59 = vmul.f32 %v818_v0, %v253_v41  ;;  %v275_v41 = vld [vmem:[%s823_s20 + $0x328] sm:$0xff] }
  0x40   : > { %v521_v58 = vadd.f32 %v828_v1, %v386_v45  ;;  %645 = vst.msk [vmem:[%s842_s25 + $0x240] sm:$0xff] %vm572_vm0, %v516_v49  ;;  %646 = vst.msk [vmem:[%s842_s25 + $0x248] sm:$0xff] %vm572_vm0, %v517_v50  ;;  %v389_v62 = vmul.f32 %v818_v0, %v254_v46  ;;  %v390_v63 = vmul.f32 %v818_v0, %v255_v47  ;;  %v276_v46 = vld [vmem:[%s823_s20 + $0x330] sm:$0xff] }
  0x41   : > { %647 = vst.msk [vmem:[%s842_s25 + $0x250] sm:$0xff] %vm572_vm0, %v518_v51  ;;  %v522_v61 = vadd.f32 %v828_v1, %v387_v52  ;;  %v391_v2 = vmul.f32 %v818_v0, %v256_v48  ;;  %648 = vst.msk [vmem:[%s842_s25 + $0x258] sm:$0xff] %vm572_vm0, %v519_v56  ;;  %v523_v4 = vadd.f32 %v828_v1, %v388_v59  ;;  %v277_v51 = vld [vmem:[%s823_s20 + $0x338] sm:$0xff]  ;;  %v278_v56 = vld [vmem:[%s823_s20 + $0x340] sm:$0xff] }
  0x42   : > { %649 = vst.msk [vmem:[%s842_s25 + $0x260] sm:$0xff] %vm572_vm0, %v520_v57  ;;  %650 = vst.msk [vmem:[%s842_s25 + $0x268] sm:$0xff] %vm572_vm0, %v521_v58  ;;  %v392_v5 = vmul.f32 %v818_v0, %v257_v53  ;;  %v393_v6 = vmul.f32 %v818_v0, %v258_v54  ;;  %v394_v7 = vmul.f32 %v818_v0, %v259_v55  ;;  %v279_v57 = vld [vmem:[%s823_s20 + $0x348] sm:$0xff]  ;;  %v280_v58 = vld [vmem:[%s823_s20 + $0x350] sm:$0xff] }
  0x43   : > { %651 = vst.msk [vmem:[%s842_s25 + $0x270] sm:$0xff] %vm572_vm0, %v522_v61  ;;  %v524_v11 = vadd.f32 %v828_v1, %v389_v62  ;;  %v525_v12 = vadd.f32 %v828_v1, %v390_v63  ;;  %v526_v13 = vadd.f32 %v828_v1, %v391_v2  ;;  %v395_v14 = vmul.f32 %v818_v0, %v260_v60  ;;  %v281_v63 = vld [vmem:[%s823_s20 + $0x358] sm:$0xff]  ;;  %v282_v2 = vld [vmem:[%s823_s20 + $0x360] sm:$0xff] }
  0x44   : > { %652 = vst.msk [vmem:[%s842_s25 + $0x278] sm:$0xff] %vm572_vm0, %v523_v4  ;;  %v527_v18 = vadd.f32 %v828_v1, %v392_v5  ;;  %v528_v19 = vadd.f32 %v828_v1, %v393_v6  ;;  %v529_v20 = vadd.f32 %v828_v1, %v394_v7  ;;  %v396_v21 = vmul.f32 %v818_v0, %v261_v3  ;;  %v283_v3 = vld [vmem:[%s823_s20 + $0x368] sm:$0xff] }
  0x45   : > { %653 = vst.msk [vmem:[%s842_s25 + $0x280] sm:$0xff] %vm572_vm0, %v524_v11  ;;  %654 = vst.msk [vmem:[%s842_s25 + $0x288] sm:$0xff] %vm572_vm0, %v525_v12  ;;  %v530_v23 = vadd.f32 %v828_v1, %v395_v14  ;;  %v397_v24 = vmul.f32 %v818_v0, %v262_v8  ;;  %v398_v25 = vmul.f32 %v818_v0, %v263_v9  ;;  %v284_v8 = vld [vmem:[%s823_s20 + $0x370] sm:$0xff] }
  0x46   : > { %655 = vst.msk [vmem:[%s842_s25 + $0x290] sm:$0xff] %vm572_vm0, %v526_v13  ;;  %v399_v26 = vmul.f32 %v818_v0, %v264_v10  ;;  %656 = vst.msk [vmem:[%s842_s25 + $0x298] sm:$0xff] %vm572_vm0, %v527_v18  ;;  %v531_v28 = vadd.f32 %v828_v1, %v396_v21  ;;  %v400_v29 = vmul.f32 %v818_v0, %v265_v15  ;;  %v285_v13 = vld [vmem:[%s823_s20 + $0x378] sm:$0xff]  ;;  %v286_v18 = vld [vmem:[%s823_s20 + $0x380] sm:$0xff] }
  0x47   : > { %657 = vst.msk [vmem:[%s842_s25 + $0x2a0] sm:$0xff] %vm572_vm0, %v528_v19  ;;  %658 = vst.msk [vmem:[%s842_s25 + $0x2a8] sm:$0xff] %vm572_vm0, %v529_v20  ;;  %v401_v30 = vmul.f32 %v818_v0, %v266_v16  ;;  %v402_v31 = vmul.f32 %v818_v0, %v267_v17  ;;  %v532_v35 = vadd.f32 %v828_v1, %v397_v24  ;;  %v287_v19 = vld [vmem:[%s823_s20 + $0x388] sm:$0xff]  ;;  %v288_v20 = vld [vmem:[%s823_s20 + $0x390] sm:$0xff] }
  0x48   : > { %659 = vst.msk [vmem:[%s842_s25 + $0x2b0] sm:$0xff] %vm572_vm0, %v530_v23  ;;  %v533_v36 = vadd.f32 %v828_v1, %v398_v25  ;;  %v534_v37 = vadd.f32 %v828_v1, %v399_v26  ;;  %v403_v38 = vmul.f32 %v818_v0, %v268_v22  ;;  %660 = vst.msk [vmem:[%s842_s25 + $0x2b8] sm:$0xff] %vm572_vm0, %v531_v28  ;;  %v289_v25 = vld [vmem:[%s823_s20 + $0x398] sm:$0xff]  ;;  %v290_v26 = vld [vmem:[%s823_s20 + $0x3a0] sm:$0xff] }
  0x49   : > { %v535_v42 = vadd.f32 %v828_v1, %v400_v29  ;;  %v536_v43 = vadd.f32 %v828_v1, %v401_v30  ;;  %v537_v44 = vadd.f32 %v828_v1, %v402_v31  ;;  %v404_v45 = vmul.f32 %v818_v0, %v269_v27  ;;  %661 = vst.msk [vmem:[%s842_s25 + $0x2c0] sm:$0xff] %vm572_vm0, %v532_v35  ;;  %v291_v27 = vld [vmem:[%s823_s20 + $0x3a8] sm:$0xff] }
  0x4a   : > { %662 = vst.msk [vmem:[%s842_s25 + $0x2c8] sm:$0xff] %vm572_vm0, %v533_v36  ;;  %663 = vst.msk [vmem:[%s842_s25 + $0x2d0] sm:$0xff] %vm572_vm0, %v534_v37  ;;  %v538_v47 = vadd.f32 %v828_v1, %v403_v38  ;;  %v405_v48 = vmul.f32 %v818_v0, %v270_v32  ;;  %v406_v49 = vmul.f32 %v818_v0, %v271_v33  ;;  %v292_v32 = vld [vmem:[%s823_s20 + $0x3b0] sm:$0xff]  ;;  %v293_v37 = vld [vmem:[%s823_s20 + $0x3b8] sm:$0xff] }
  0x4b   : > { %v407_v50 = vmul.f32 %v818_v0, %v272_v34  ;;  %664 = vst.msk [vmem:[%s842_s25 + $0x2d8] sm:$0xff] %vm572_vm0, %v535_v42  ;;  %665 = vst.msk [vmem:[%s842_s25 + $0x2e0] sm:$0xff] %vm572_vm0, %v536_v43  ;;  %v539_v52 = vadd.f32 %v828_v1, %v404_v45  ;;  %v408_v53 = vmul.f32 %v818_v0, %v273_v39  ;;  %v294_v42 = vld [vmem:[%s823_s20 + $0x3c0] sm:$0xff]  ;;  %v295_v43 = vld [vmem:[%s823_s20 + $0x3c8] sm:$0xff] }
  0x4c   : > { %666 = vst.msk [vmem:[%s842_s25 + $0x2e8] sm:$0xff] %vm572_vm0, %v537_v44  ;;  %v409_v54 = vmul.f32 %v818_v0, %v274_v40  ;;  %v410_v55 = vmul.f32 %v818_v0, %v275_v41  ;;  %667 = vst.msk [vmem:[%s842_s25 + $0x2f0] sm:$0xff] %vm572_vm0, %v538_v47  ;;  %v540_v59 = vadd.f32 %v828_v1, %v405_v48  ;;  %v296_v44 = vld [vmem:[%s823_s20 + $0x3d0] sm:$0xff] }
  0x4d   : > { %v541_v60 = vadd.f32 %v828_v1, %v406_v49  ;;  %v542_v61 = vadd.f32 %v828_v1, %v407_v50  ;;  %v411_v62 = vmul.f32 %v818_v0, %v276_v46  ;;  %668 = vst.msk [vmem:[%s842_s25 + $0x2f8] sm:$0xff] %vm572_vm0, %v539_v52  ;;  %v543_v4 = vadd.f32 %v828_v1, %v408_v53  ;;  %v297_v49 = vld [vmem:[%s823_s20 + $0x3d8] sm:$0xff]  ;;  %v298_v50 = vld [vmem:[%s823_s20 + $0x3e0] sm:$0xff] }
  0x4e   : > { %v544_v5 = vadd.f32 %v828_v1, %v409_v54  ;;  %v545_v6 = vadd.f32 %v828_v1, %v410_v55  ;;  %v412_v7 = vmul.f32 %v818_v0, %v277_v51  ;;  %669 = vst.msk [vmem:[%s842_s25 + $0x300] sm:$0xff] %vm572_vm0, %v540_v59  ;;  %v413_v10 = vmul.f32 %v818_v0, %v278_v56  ;;  %v299_v51 = vld [vmem:[%s823_s20 + $0x3e8] sm:$0xff]  ;;  %v300_v56 = vld [vmem:[%s823_s20 + $0x3f0] sm:$0xff] }
  0x4f   : > { %670 = vst.msk [vmem:[%s842_s25 + $0x308] sm:$0xff] %vm572_vm0, %v541_v60  ;;  %671 = vst.msk [vmem:[%s842_s25 + $0x310] sm:$0xff] %vm572_vm0, %v542_v61  ;;  %v546_v9 = vadd.f32 %v828_v1, %v411_v62  ;;  %v414_v11 = vmul.f32 %v818_v0, %v279_v57  ;;  %v415_v12 = vmul.f32 %v818_v0, %v280_v58  ;;  %v301_v61 = vld [vmem:[%s823_s20 + $0x3f8] sm:$0xff] }
  0x50   : > { %672 = vst.msk [vmem:[%s842_s25 + $0x318] sm:$0xff] %vm572_vm0, %v543_v4  ;;  %673 = vst.msk [vmem:[%s842_s25 + $0x320] sm:$0xff] %vm572_vm0, %v544_v5  ;;  %v547_v14 = vadd.f32 %v828_v1, %v412_v7  ;;  %v416_v15 = vmul.f32 %v818_v0, %v281_v63  ;;  %v417_v16 = vmul.f32 %v818_v0, %v282_v2 }
  0x51   : > { %674 = vst.msk [vmem:[%s842_s25 + $0x328] sm:$0xff] %vm572_vm0, %v545_v6  ;;  %v418_v17 = vmul.f32 %v818_v0, %v283_v3  ;;  %675 = vst.msk [vmem:[%s842_s25 + $0x330] sm:$0xff] %vm572_vm0, %v546_v9  ;;  %v548_v21 = vadd.f32 %v828_v1, %v413_v10  ;;  %v549_v22 = vadd.f32 %v828_v1, %v414_v11 }
  0x52   : > { %v550_v23 = vadd.f32 %v828_v1, %v415_v12  ;;  %v419_v24 = vmul.f32 %v818_v0, %v284_v8  ;;  %676 = vst.msk [vmem:[%s842_s25 + $0x338] sm:$0xff] %vm572_vm0, %v547_v14  ;;  %v551_v28 = vadd.f32 %v828_v1, %v416_v15  ;;  %v552_v29 = vadd.f32 %v828_v1, %v417_v16 }
  0x53   : > { %v553_v30 = vadd.f32 %v828_v1, %v418_v17  ;;  %v420_v31 = vmul.f32 %v818_v0, %v285_v13  ;;  %677 = vst.msk [vmem:[%s842_s25 + $0x340] sm:$0xff] %vm572_vm0, %v548_v21  ;;  %678 = vst.msk [vmem:[%s842_s25 + $0x348] sm:$0xff] %vm572_vm0, %v549_v22  ;;  %v421_v34 = vmul.f32 %v818_v0, %v286_v18  ;;  %v778_v13 = vld [vmem:[%s1482_s2] ss:$0 sm:$0xff] }
  0x54   : > { %679 = vst.msk [vmem:[%s842_s25 + $0x350] sm:$0xff] %vm572_vm0, %v550_v23  ;;  %v554_v33 = vadd.f32 %v828_v1, %v419_v24  ;;  %v422_v35 = vmul.f32 %v818_v0, %v287_v19  ;;  %v423_v36 = vmul.f32 %v818_v0, %v288_v20  ;;  %680 = vst.msk [vmem:[%s842_s25 + $0x358] sm:$0xff] %vm572_vm0, %v551_v28 }
  0x55   : > { %681 = vst.msk [vmem:[%s842_s25 + $0x360] sm:$0xff] %vm572_vm0, %v552_v29  ;;  %682 = vst.msk [vmem:[%s842_s25 + $0x368] sm:$0xff] %vm572_vm0, %v553_v30  ;;  %v555_v38 = vadd.f32 %v828_v1, %v420_v31  ;;  %v424_v39 = vmul.f32 %v818_v0, %v289_v25  ;;  %v425_v40 = vmul.f32 %v818_v0, %v290_v26 }
  0x56   : > { %v426_v41 = vmul.f32 %v818_v0, %v291_v27  ;;  %683 = vst.msk [vmem:[%s842_s25 + $0x370] sm:$0xff] %vm572_vm0, %v554_v33  ;;  %v556_v45 = vadd.f32 %v828_v1, %v421_v34  ;;  %v557_v46 = vadd.f32 %v828_v1, %v422_v35  ;;  %v558_v47 = vadd.f32 %v828_v1, %v423_v36 }
  0x57   : > { %v427_v48 = vmul.f32 %v818_v0, %v292_v32  ;;  %684 = vst.msk [vmem:[%s842_s25 + $0x378] sm:$0xff] %vm572_vm0, %v555_v38  ;;  %v559_v52 = vadd.f32 %v828_v1, %v424_v39  ;;  %v560_v53 = vadd.f32 %v828_v1, %v425_v40  ;;  %v428_v55 = vmul.f32 %v818_v0, %v293_v37 }
  0x58   : > { %v561_v54 = vadd.f32 %v828_v1, %v426_v41  ;;  %685 = vst.msk [vmem:[%s842_s25 + $0x380] sm:$0xff] %vm572_vm0, %v556_v45  ;;  %686 = vst.msk [vmem:[%s842_s25 + $0x388] sm:$0xff] %vm572_vm0, %v557_v46  ;;  %v429_v58 = vmul.f32 %v818_v0, %v294_v42  ;;  %v430_v59 = vmul.f32 %v818_v0, %v295_v43 }
  0x59   : > { %687 = vst.msk [vmem:[%s842_s25 + $0x390] sm:$0xff] %vm572_vm0, %v558_v47  ;;  %v562_v57 = vadd.f32 %v828_v1, %v427_v48  ;;  %v431_v60 = vmul.f32 %v818_v0, %v296_v44  ;;  %688 = vst.msk [vmem:[%s842_s25 + $0x398] sm:$0xff] %vm572_vm0, %v559_v52  ;;  %v563_v62 = vadd.f32 %v828_v1, %v428_v55 }
  0x5a   : > { %689 = vst.msk [vmem:[%s842_s25 + $0x3a0] sm:$0xff] %vm572_vm0, %v560_v53  ;;  %690 = vst.msk [vmem:[%s842_s25 + $0x3a8] sm:$0xff] %vm572_vm0, %v561_v54  ;;  %v432_v63 = vmul.f32 %v818_v0, %v297_v49  ;;  %v433_v2 = vmul.f32 %v818_v0, %v298_v50  ;;  %v434_v3 = vmul.f32 %v818_v0, %v299_v51 }
  0x5b   : > { %691 = vst.msk [vmem:[%s842_s25 + $0x3b0] sm:$0xff] %vm572_vm0, %v562_v57  ;;  %v564_v4 = vadd.f32 %v828_v1, %v429_v58  ;;  %v565_v5 = vadd.f32 %v828_v1, %v430_v59  ;;  %v566_v6 = vadd.f32 %v828_v1, %v431_v60  ;;  %v435_v7 = vmul.f32 %v818_v0, %v300_v56 }
  0x5c   : > { %692 = vst.msk [vmem:[%s842_s25 + $0x3b8] sm:$0xff] %vm572_vm0, %v563_v62  ;;  %v567_v8 = vadd.f32 %v828_v1, %v432_v63  ;;  %v568_v9 = vadd.f32 %v828_v1, %v433_v2  ;;  %v569_v10 = vadd.f32 %v828_v1, %v434_v3  ;;  %v436_v11 = vmul.f32 %v818_v0, %v301_v61 }
  0x5d   : > { %693 = vst.msk [vmem:[%s842_s25 + $0x3c0] sm:$0xff] %vm572_vm0, %v564_v4  ;;  %694 = vst.msk [vmem:[%s842_s25 + $0x3c8] sm:$0xff] %vm572_vm0, %v565_v5  ;;  %v570_v12 = vadd.f32 %v828_v1, %v435_v7 }
  0x5e   : > { %695 = vst.msk [vmem:[%s842_s25 + $0x3d0] sm:$0xff] %vm572_vm0, %v566_v6  ;;  %696 = vst.msk [vmem:[%s842_s25 + $0x3d8] sm:$0xff] %vm572_vm0, %v567_v8  ;;  %v571_v14 = vadd.f32 %v778_v13, %v436_v11 }
  0x5f   : > { %697 = vst.msk [vmem:[%s842_s25 + $0x3e0] sm:$0xff] %vm572_vm0, %v568_v9  ;;  %698 = vst.msk [vmem:[%s842_s25 + $0x3e8] sm:$0xff] %vm572_vm0, %v569_v10 }
  0x60   : > { %699 = vst.msk [vmem:[%s842_s25 + $0x3f0] sm:$0xff] %vm572_vm0, %v570_v12  ;;  %700 = vst.msk [vmem:[%s842_s25 + $0x3f8] sm:$0xff] %vm572_vm0, %v571_v14 }
  0x61 PF: > { %s13_s12 = sadd.s32 1, %s785_s12  }
  0x62   : > { %p10_p4 = scmp.ge.s32.totalorder %s13_s12, 10  }
  0x64   :  { %12 = sbr.rel (!%p10_p4) target bundleno = 1 (0x1), region = 62 }

</bundles_post_ra>
